<compile_context>
chip_gen: v7x
topology: tpu7x:2x2x1
jax: 0.10.0
libtpu: 0.0.40
codegen_flags: <defaults>
</compile_context>

<pallas_src>
import jax
import jax.numpy as jnp
from jax.experimental import pallas as pl
from jax.experimental.pallas import tpu as pltpu


def _transition_kernel(w_ref, shift_ref, x_ref, o_ref):
    # w_ref:     (Cout, Cin)      folded (BN-scale * conv) weight, bf16
    # shift_ref: (Cout, 1)        folded BN shift, f32
    # x_ref:     (Cin, tile_hw)   spatial tile of one batch element, native dtype (f32)
    # o_ref:     (Cout, tile_hw)  lane-dense output tile (bf16 by default)
    x = x_ref[...].astype(jnp.bfloat16)                      # in-kernel cast (VPU, free)
    y = jnp.dot(w_ref[...], x, preferred_element_type=jnp.float32)
    y = y + shift_ref[...]                                   # f32 bias-add (broadcast over lanes)
    o_ref[...] = jnp.maximum(y, 0.0).astype(o_ref.dtype)     # f32 ReLU, cast at store


def _pick_tile_hw(hw, cin, cout, in_bytes, out_bytes, budget_bytes,
                  min_spatial_tiles=1):
    """Largest multiple-of-128 spatial tile that fits the VMEM budget.

    Does NOT require the tile to divide hw: the tail block is handled by
    pl.cdiv + Pallas partial-block masking (padded lanes only affect padded
    output columns, which are never written back).
    """
    hw_pad = max(128, -(-hw // 128) * 128)   # hw rounded up to a 128 multiple

    def fits(t):
        need = (2 * t * cin * in_bytes       # double-buffered x tile
                + 2 * t * cout * out_bytes   # double-buffered output tile
                + t * cout * 4               # f32 matmul intermediate
                + cout * (cin * 2 + 4))      # resident bf16 weight + f32 shift
        return need <= budget_bytes

    candidates = [t for t in (8192, 4096, 2048, 1024, 512, 256, 128) if t <= hw_pad]
    if not candidates:
        candidates = [128]
    fitting = [t for t in candidates if fits(t)] or [128]

    # Prefer the largest fitting tile that still yields >= min_spatial_tiles
    # grid steps along the spatial axis (keeps both v7x TCs busy when N==1).
    for t in fitting:                         # descending order
        if -(-hw_pad // t) >= min_spatial_tiles:
            return t
    return fitting[0]


def transition_block(x_nchw, conv_w, gamma, beta, running_mean, running_var,
                     eps=1e-5, *, out_dtype=jnp.bfloat16):
    """TransitionBlock forward (eval-mode BatchNorm), native NCHW layout.

    x_nchw: (N, Cin, H, W).  conv_w: (Cout, Cin, 1, 1).
    Returns (N, Cout, H, W) in `out_dtype` (bf16 by default; f32 accumulation).
    """
    N, Cin, H, W = x_nchw.shape
    Cout = conv_w.shape[0]
    HW = H * W

    # --- fold BatchNorm (running stats) into the 1x1 conv -------------------
    inv_std = 1.0 / jnp.sqrt(running_var.astype(jnp.float32) + eps)
    scale = gamma.astype(jnp.float32) * inv_std                     # (Cout,)
    shift = beta.astype(jnp.float32) - running_mean.astype(jnp.float32) * scale
    w_folded = scale[:, None] * conv_w.reshape(Cout, Cin).astype(jnp.float32)

    # --- native-layout operands (reshape only, never transpose/convert) -----
    x_flat = x_nchw.reshape(N, Cin, HW)                              # native dtype
    w_mat = w_folded.astype(jnp.bfloat16)                            # (Cout, Cin), tiny
    shift_col = shift.reshape(Cout, 1)                               # (Cout, 1), f32

    in_bytes = jnp.dtype(x_flat.dtype).itemsize
    out_bytes = jnp.dtype(out_dtype).itemsize
    tile_hw = _pick_tile_hw(
        HW, Cin, Cout, in_bytes, out_bytes,
        budget_bytes=16 * 1024 * 1024,           # conservative: safe on v7x (64 MiB VMEM)
        min_spatial_tiles=2 if N < 2 else 1)
    grid = (N, pl.cdiv(HW, tile_hw))

    out_flat = pl.pallas_call(
        _transition_kernel,
        out_shape=jax.ShapeDtypeStruct((N, Cout, HW), out_dtype),
        grid_spec=pltpu.PrefetchScalarGridSpec(
            num_scalar_prefetch=0,
            grid=grid,
            in_specs=[
                pl.BlockSpec((Cout, Cin), lambda n, j: (0, 0)),          # folded weight
                pl.BlockSpec((Cout, 1), lambda n, j: (0, 0)),            # folded shift
                pl.BlockSpec((None, Cin, tile_hw), lambda n, j: (n, 0, j)),
            ],
            out_specs=pl.BlockSpec((None, Cout, tile_hw), lambda n, j: (n, 0, j)),
        ),
        compiler_params=pltpu.CompilerParams(
            dimension_semantics=("parallel", "parallel"),
            vmem_limit_bytes=48 * 1024 * 1024,
        ),
    )(w_mat, shift_col, x_flat)

    # (N, Cout, H*W) -> (N, Cout, H, W): pure reshape, no HBM transpose.
    return out_flat.reshape(N, Cout, H, W)


if __name__ == "__main__":
    # Small demo shapes consistent with the module's forward (1x1 conv).
    N, Cin, H, W = 2, 4, 16, 16
    Cout = 8

    key = jax.random.PRNGKey(0)
    kx, kw, kg, kb, km, kv = jax.random.split(key, 6)

    x = jax.random.normal(kx, (N, Cin, H, W), dtype=jnp.float32)

    conv_w = jax.random.normal(kw, (Cout, Cin, 1, 1), dtype=jnp.float32) * 0.1
    gamma = 1.0 + 0.1 * jax.random.normal(kg, (Cout,), dtype=jnp.float32)
    beta = 0.1 * jax.random.normal(kb, (Cout,), dtype=jnp.float32)
    running_mean = 0.1 * jax.random.normal(km, (Cout,), dtype=jnp.float32)
    running_var = jnp.abs(1.0 + 0.1 * jax.random.normal(kv, (Cout,), dtype=jnp.float32))

    out = transition_block(x, conv_w, gamma, beta, running_mean, running_var)
    out = jax.block_until_ready(out)

    # Reference in plain JAX (f32). bf16 matmul inputs + bf16 output => loosened tol.
    y_ref = jnp.einsum('nchw,oc->nohw', x, conv_w.reshape(Cout, Cin))
    y_ref = (y_ref - running_mean[None, :, None, None]) / jnp.sqrt(
        running_var[None, :, None, None] + 1e-5)
    y_ref = y_ref * gamma[None, :, None, None] + beta[None, :, None, None]
    y_ref = jnp.maximum(y_ref, 0.0)

    assert out.shape == (N, Cout, H, W)
    assert out.dtype == jnp.bfloat16
    assert jnp.allclose(out.astype(jnp.float32), y_ref, atol=3e-2, rtol=3e-2)

    print("KERNEL_OK")
</pallas_src>

<mosaic_0001>
module attributes {stable_mosaic.version = 11 : i64} {
  func.func @_transition_kernel(%arg0: i32, %arg1: i32, %arg2: memref<8x4xbf16, #tpu.memory_space<vmem>>, %arg3: memref<8x1xf32, #tpu.memory_space<vmem>>, %arg4: memref<1x4x256xf32, #tpu.memory_space<vmem>>, %arg5: memref<1x8x256xbf16, #tpu.memory_space<vmem>>) attributes {dimension_semantics = [#tpu.dimension_semantics<parallel>, #tpu.dimension_semantics<parallel>], iteration_bounds = array<i64: 2, 1>, scalar_prefetch = 0 : i64, scratch_operands = 0 : i64, tpu.core_type = #tpu.core_type<tc>, window_params = [{pipeline_mode = #tpu.pipeline_mode<synchronous>, transform_indices = @transform_0, window_bounds = array<i64: 8, 4>}, {pipeline_mode = #tpu.pipeline_mode<synchronous>, transform_indices = @transform_1, window_bounds = array<i64: 8, 1>}, {transform_indices = @transform_2, window_bounds = array<i64: 1, 4, 256>}, {transform_indices = @transform_3, window_bounds = array<i64: 1, 8, 256>}]} {
    %c0 = arith.constant 0 : index
    %c0_0 = arith.constant 0 : index
    %c0_1 = arith.constant 0 : index
    %0 = vector.load %arg4[%c0, %c0_0, %c0_1] : memref<1x4x256xf32, #tpu.memory_space<vmem>>, vector<1x4x256xf32>
    %1 = vector.shape_cast %0 : vector<1x4x256xf32> to vector<4x256xf32>
    %2 = arith.truncf %1 : vector<4x256xf32> to vector<4x256xbf16>
    %c0_2 = arith.constant 0 : index
    %c0_3 = arith.constant 0 : index
    %3 = vector.load %arg2[%c0_2, %c0_3] : memref<8x4xbf16, #tpu.memory_space<vmem>>, vector<8x4xbf16>
    %cst = arith.constant dense<0.000000e+00> : vector<8x256xf32>
    %4 = tpu.matmul %3, %2, %cst {dimension_numbers = #tpu.dot_dimension_numbers<[1], [0], [0], [1], [0, 0, 1, 1], [], []>} : vector<8x4xbf16>, vector<4x256xbf16>, vector<8x256xf32> -> vector<8x256xf32>
    %c0_4 = arith.constant 0 : index
    %c0_5 = arith.constant 0 : index
    %5 = vector.load %arg3[%c0_4, %c0_5] : memref<8x1xf32, #tpu.memory_space<vmem>>, vector<8x1xf32>
    %6 = vector.broadcast %5 : vector<8x1xf32> to vector<8x256xf32>
    %7 = arith.addf %4, %6 : vector<8x256xf32>
    %cst_6 = arith.constant 0.000000e+00 : f32
    %8 = vector.broadcast %cst_6 : f32 to vector<8x256xf32>
    %9 = arith.maximumf %7, %8 : vector<8x256xf32>
    %10 = arith.truncf %9 : vector<8x256xf32> to vector<8x256xbf16>
    %c0_7 = arith.constant 0 : index
    %c0_8 = arith.constant 0 : index
    %c0_9 = arith.constant 0 : index
    %11 = vector.load %arg5[%c0_7, %c0_8, %c0_9] : memref<1x8x256xbf16, #tpu.memory_space<vmem>>, vector<1x8x256xbf16>
    %12 = vector.shape_cast %11 : vector<1x8x256xbf16> to vector<8x256xbf16>
    %13 = vector.shape_cast %10 : vector<8x256xbf16> to vector<1x8x256xbf16>
    tpu.vector_store %arg5[%c0_7, %c0_8, %c0_9], %13 {strides = array<i32>} : memref<1x8x256xbf16, #tpu.memory_space<vmem>>, vector<1x8x256xbf16>,
    return
  }
  func.func @transform_0(%arg0: i32, %arg1: i32) -> (i32, i32) {
    %c0_i32 = arith.constant 0 : i32
    %c0_i32_0 = arith.constant 0 : i32
    %c0_i32_1 = arith.constant 0 : i32
    return %c0_i32, %c0_i32_0 : i32, i32
  }
  func.func @transform_1(%arg0: i32, %arg1: i32) -> (i32, i32) {
    %c0_i32 = arith.constant 0 : i32
    %c0_i32_0 = arith.constant 0 : i32
    %c0_i32_1 = arith.constant 0 : i32
    return %c0_i32, %c0_i32_0 : i32, i32
  }
  func.func @transform_2(%arg0: i32, %arg1: i32) -> (i32, i32, i32) {
    %c0_i32 = arith.constant 0 : i32
    %c0_i32_0 = arith.constant 0 : i32
    return %arg0, %c0_i32, %arg1 : i32, i32, i32
  }
  func.func @transform_3(%arg0: i32, %arg1: i32) -> (i32, i32, i32) {
    %c0_i32 = arith.constant 0 : i32
    %c0_i32_0 = arith.constant 0 : i32
    return %arg0, %c0_i32, %arg1 : i32, i32, i32
  }
}

</mosaic_0001>

<bundles_post_ra>
// kernel: tpu_custom_call.1
= control target key start
LH: loop header
LB: loop body
LE: loop exit
PB: predicated region body
PF: predicated region fallthrough
CT: control target
= control target key end

     0   :  { %8 = vsyncpa [#allocation3], 0  ;;  %s667_s0 = inlined_call_operand.vmem [shape: bf16[8,4], index: 0, kind: input, shape index: {}]   ;;  %s668_s1 = inlined_call_operand.vmem [shape: f32[8,1], index: 1, kind: input, shape index: {}]   ;;  %s669_s2 = inlined_call_operand.vmem [shape: f32[2,4,256], index: 2, kind: input, shape index: {}]   ;;  %s670_s3 = inlined_call_operand.hbm [shape: bf16[2,8,256], index: 3, kind: output, shape index: {}]  }
   0x1   :  { %10 = vsyncpa [#allocation3 + $0x1], 0  ;;  %s549_s12 = smov 0   ;;  %s551_s13 = smov 0  }
   0x2   :  { %s553_s14 = smov 0   ;;  %s555_s15 = smov 0  }
   0x3   :  { %s557_s16 = smov 0   ;;  %s559_s17 = smov 0  }
   0x4 LB: > { %s370_s18 = sadd.s32 4294967295, %s525_s17   ;;  %s371_s19 = sadd.s32 4294967294, %s525_s17   ;;  %s525_s17 = sphi %s559_s17, %s16_s17   ;;  %s521_s16 = sphi %s557_s16, %s677_s16   ;;  %s517_s15 = sphi %s555_s15, %s676_s15   ;;  %s513_s14 = sphi %s553_s14, %s675_s14   ;;  %s509_s13 = sphi %s551_s13, %s674_s13   ;;  %s505_s12 = sphi %s549_s12, %s673_s12  }
   0x5   : > { %s28_s20 = sadd.s32 1, %s521_s16  ;;  %s107_s21 = sadd.s32 1, %s513_s14 }
   0x6   : > { %p30_p0 = scmp.ge.s32.totalorder %s28_s20, 2  ;;  %p117_p1 = scmp.ne.s32.totalorder %s513_s14, %s509_s13 }
   0x7   : > { %p118_p2 = scmp.eq.s32.totalorder %s370_s18, 1  ;;  %p123_p3 = scmp.ne.s32.totalorder %s509_s13, %s505_s12 }
   0x8   : > { %s679_s20 = smov (%p30_p0, %s28_s20), 0  ;;  %p124_p5 = scmp.eq.s32.totalorder %s371_s19, 1 }
   0x9   : > { %p589_p4 = por %p118_p2, %p117_p1  ;;  %s102_s23 = ssub.s32 %s521_s16, %s679_s20 }
   0xa   : > { %p374_p6 = scmp.ge.s32.totalorder %s525_s17, 1  ;;  %p105_p7 = scmp.eq.s32.totalorder %s102_s23, 0 }
   0xb   : > { %p596_p8 = por %p124_p5, %p123_p3  ;;  %p161_p9 = scmp.lt.s32.totalorder %s525_s17, 3 }
   0xc   : > { %s602_s25 = scalar_select %p105_p7, %s513_s14, %s107_s21  }
   0xd   : > { %p162_p10 = pnand %p374_p6, %p161_p9 }
   0xe   : > { %p190_p11 = scmp.lt.s32.totalorder (!%p162_p10), %s517_s15, 1  ;;  %v527_v0 = vmov (!%p162_p10), 0   ;;  %v208_v1 = vld [vmem:[%s668_s1] sm:$0xff] (!%p162_p10)  ;;  %vm218_vm0 = vcmask (!%p162_p10), 1041408   ;;  %vm214_vm1 = vcmask (!%p162_p10), 31744   ;;  %s186_s8 = sand.u32 (!%p162_p10), 1, %s509_s13  }
   0xf   : > { %165 = sbr.rel (%p162_p10) target bundleno = 268 (0x10c), region = 32  ;;  %257 = vmatprep.mubr.bf16.mxu0 (!%p162_p10), %v527_v0  ;;  %445 = vset.pattern.permute.xlu0 (!%p162_p10), %v527_v0  ;;  %v207_v7 = vld [vmem:[%s667_s0] sm:$0xf] (!%p162_p10)  ;;  %s375_s9 = sshll.u32 (!%p162_p10), %s186_s8, 3 }
  0x10   : > { %211 = vperm.xlu0 (!%p162_p10), %445, %v208_v1   ;;  %s388_s10 = sshll.u32 (!%p162_p10), %s517_s15, 7  ;;  %s188_s11 = scalar_lea.vmem (!%p162_p10), [#allocation2], %s375_s9 }
  0x11   : > { %s294_s18 = sshll.u32 (!%p162_p10), %s188_s11, 4  ;;  %s620_s23 = scalar_lea.hbm (!%p162_p10), %s670_s3, %s388_s10  ;;  %s622_s18 = int_to_ptr.vmem [resolvable:$true] %s294_s18 }
  0x12   : > { %s278_s26 = scalar_lea.sflag (!%p162_p10), [#allocation3], %s186_s8  ;;  %s447_s27 = scalar_lea.vmem (!%p162_p10), %s622_s18, 128 }
  0x13   : > { %p448_p12 = scmp.ne.s32.totalorder (!%p162_p10), %s622_s18, %s447_s27 }
  0x15   : > { %p449_p13 = pnand (!%p162_p10), %p448_p12, %p589_p4 }
  0x16   : > { %s191_s28 = scalar_select %p190_p11, %s517_s15, 1 }
  0x17   : > { %p450_p0 = pneg %p449_p13  ;;  %s528_s15 = smov [#allocation2]  }
  0x18   : > { %s386_s29 = sshll.u32 %s191_s28, 3  ;;  %s451_s28 = sshll.u32 %s528_s15, 4  ;;  %s452_s28 = int_to_ptr.vmem [resolvable:$false] %s451_s28 }
  0x19   : > { %s197_s5 = scalar_lea.vmem %s669_s2, %s386_s29  ;;  %s453_s29 = scalar_lea.vmem %s452_s28, 256 }
  0x1a   : > { %v201_v2 = vld [vmem:[%s197_s5] sm:$0xff]  ;;  %p454_p1 = scmp.lt.s32.totalorder %s622_s18, %s452_s28  ;;  %p455_p2 = scmp.lt.s32.totalorder %s453_s29, %s447_s27 }
  0x1b   : > { %v203_v3 = vcombine.high %v201_v2, %v201_v2  ;;  %v205_v4 = vpack.c.bf16 %v201_v2, %v201_v2 }
  0x1c   : > { %p456_p3 = por %p455_p2, %p454_p1 }
  0x1d   : > { %v206_v5 = vpack.c.bf16 %v203_v3, %v203_v3  ;;  %v220_v6 = vsel %vm218_vm0, %v205_v4, 0 }
  0x1e   : > { %p457_p5 = pnand %p456_p3, %p450_p0 }
  0x1f   : > { %378 = vmatprep.subr.msk.bf16.mxu0 %vm218_vm0, %v206_v5 }
  0x20   : > { %226 = vmatpush1.bf16.msra.mxu0 %v220_v6 }
  0x23   : > { %379 = vmatmul.mubr.msk.bf16.vlgmr.msra.gmra.mrb[0].mxu0 %vm214_vm1, %v207_v7 }
  0x8f   : > { %v212_v8 = vpop.permute.xlu0 %211 }
  0xf6   : > { %v259_v9 = vpop.f32.mrb[0].mxu0 }
  0xf7   : > { %v260_v10 = vadd.f32 %v259_v9, %v212_v8  ;;  %v261_v11 = vpop.f32.mrb[1].mxu0 }
  0xf8   : > { %v262_v12 = vadd.f32 %v261_v11, %v212_v8  ;;  %v263_v13 = vpop.f32.mrb[2].mxu0 }
  0xf9   : > { %v266_v14 = vmax.f32 %v260_v10, 0.0  ;;  %v264_v15 = vpop.f32.mrb[3].mxu0 }
  0xfa   : > { %v267_v16 = vmax.f32 %v262_v12, 0.0 }
  0xfc   : > { %v387_v17 = vpack.c.bf16 %v267_v16, %v266_v14 }
  0xfe   : > { %276 = vst [vmem:[%s188_s11] sm:$0xff] %v387_v17 }
  0xff   : > { %460 = shalt.err (!%p457_p5)
}
 0x100   : > { %s461_s30 = scalar_lea.hbm %s620_s23, 128  ;;  %s465_s6 = scalar_lea.hbm %s670_s3, 256 }
 0x101   : > { %p462_p6 = scmp.ne.s32.totalorder %s620_s23, %s461_s30  ;;  %p466_p10 = scmp.lt.u32.totalorder %s620_s23, %s670_s3 }
 0x102   : > { %p467_p11 = scmp.lt.u32.totalorder %s465_s6, %s461_s30  ;;  %p469_p13 = scmp.lt.u32.totalorder %s461_s30, %s620_s23 }
 0x103   : > { %p463_p7 = pnand %p462_p6, %p589_p4 }
 0x104   : > { %p468_p12 = por %p467_p11, %p466_p10 }
 0x105   : > { %p464_p9 = pneg %p463_p7 }
 0x106   : > { %p470_p0 = por %p469_p13, %p468_p12 }
 0x108   : > { %p471_p1 = pnand %p470_p0, %p464_p9 }
 0x10a   : > { %474 = shalt.err (!%p471_p1)
}
 0x10b   : > { %389 = dma.vmem_to_hbm [thread:$0]  (%p589_p4), %s622_s18, 128, %s620_s23, %s278_s26  }
 0x10c PF: > { %p395_p2 = scmp.ge.s32.totalorder %s525_s17, 2  ;;  %s306_s9 = sand.u32 1, %s505_s12  }
 0x10d   : > { %s307_s10 = scalar_lea.sflag [#allocation3], %s306_s9 }
 0x10e   : > { %p392_p3 = pnand %p395_p2, %p596_p8 }
 0x110   : > { %500 = dma.done.wait (!%p392_p3), %s307_s10, 128  }
 0x111   : > { %502 = vsyncadd (!%p392_p3), %s307_s10, 4294967168  ;;  %s16_s17 = sadd.s32 1, %s525_s17   ;;  %s673_s12 = smov %s509_s13 }
 0x112   : > { %p13_p5 = scmp.ge.s32.totalorder %s16_s17, 4   ;;  %s674_s13 = smov %s513_s14 }
 0x113   : > { %s675_s14 = smov %s602_s25  ;;  %s676_s15 = smov %s521_s16 }
 0x114   : > { %s677_s16 = smov %s679_s20  ;;  %15 = sbr.rel (!%p13_p5) target bundleno = 4 (0x4), region = 67 }
 0x11b   :  { %312 = vsyncpa [#allocation3], 1 }
 0x11c   :  { %314 = vsyncpa [#allocation3 + $0x1], 1 }

</bundles_post_ra>
